<compile_context>
chip_gen: v5e
topology: v5e:2x2
jax: 0.10.0
libtpu: 0.0.40
codegen_flags: <defaults>
</compile_context>

<pallas_src>
import functools

import jax
import jax.numpy as jnp
import numpy as np
from jax.experimental import pallas as pl
from jax.experimental.pallas import tpu as pltpu


# ----------------------------- configuration -------------------------------
Z_DIM = 32          # z_dim of each embedding vector
H, K = 2, 3         # z_num = (h, k)
F_SIZE = 3          # hypernet conv filter size
IN_SIZE = 4         # hypernet in_size
OUT_SIZE = 4        # hypernet out_size
OUT_FF = OUT_SIZE * F_SIZE * F_SIZE   # 36
FUSED_N = IN_SIZE * OUT_FF            # 144
PADDED_N = 256                        # lane-dense multiple of 128 (144 -> 256)

_HI = jax.lax.Precision.HIGHEST       # fp32-accurate matmuls outside the kernel


# ------------------------------- kernel ------------------------------------
def embedding_hyper_kernel(z_ref, w_ref, b_ref, out_ref):
    """Single invocation: all embeddings at once.

    z_ref  : (N, Z_DIM)          all stacked z embeddings
    w_ref  : (Z_DIM, PADDED_N)   fused effective weight, lane-padded with zeros
    b_ref  : (1, PADDED_N)       fused effective bias, lane-padded with zeros
    out_ref: (N, PADDED_N)       per-embedding (IN_SIZE, OUT_FF) slab (+ pad)
    """
    out_ref[...] = (
        jnp.dot(z_ref[...], w_ref[...], preferred_element_type=jnp.float32)
        + b_ref[...]
    )


# ------------------------------- factory ------------------------------------
def make_embedding_forward(w1, b1, w2, b2):
    """Precompute fused, lane-padded hypernet weights ONCE; return jitted fwd.

    Fusion (exact by associativity):
        h_final[r, :] = z @ (W1_r @ W2) + (b1_r @ W2 + b2)
      W_eff[d, r*OUT_FF + c] = sum_e W1[d, r*Z_DIM + e] * W2[e, c]
      b_eff[r*OUT_FF + c]    = sum_e b1[r*Z_DIM + e]    * W2[e, c] + b2[c]
    """
    w1_3d = w1.reshape(Z_DIM, IN_SIZE, Z_DIM)                       # [d, r, e]
    w_eff = jnp.einsum("dre,ec->drc", w1_3d, w2,
                       precision=_HI).reshape(Z_DIM, FUSED_N)       # (32, 144)
    b_eff = (jnp.dot(b1.reshape(IN_SIZE, Z_DIM), w2, precision=_HI)
             + b2).reshape(1, FUSED_N)                              # (1, 144)

    # Zero-pad lanes 144 -> 256 so the kernel's stores are unmasked lane-dense.
    w_eff_p = jnp.zeros((Z_DIM, PADDED_N), jnp.float32).at[:, :FUSED_N].set(w_eff)
    b_eff_p = jnp.zeros((1, PADDED_N), jnp.float32).at[:, :FUSED_N].set(b_eff)
    w_eff_p = jax.block_until_ready(w_eff_p)   # materialize once, up front
    b_eff_p = jax.block_until_ready(b_eff_p)

    @jax.jit
    def forward(z_all):
        n = z_all.shape[0]

        cost = pl.CostEstimate(
            flops=2 * n * Z_DIM * PADDED_N,
            bytes_accessed=4 * (n * Z_DIM + Z_DIM * PADDED_N
                                + PADDED_N + n * PADDED_N),
            transcendentals=0,
        )

        out = pl.pallas_call(
            embedding_hyper_kernel,
            out_shape=jax.ShapeDtypeStruct((n, PADDED_N), jnp.float32),
            # Gridless: one invocation, full-array blocks (~40 KB total VMEM —
            # trivially fits on v5e/v6e/v7x; no re-tiling needed for v7x).
            in_specs=[
                pl.BlockSpec((n, Z_DIM), lambda: (0, 0),
                             memory_space=pltpu.MemorySpace.VMEM),
                pl.BlockSpec((Z_DIM, PADDED_N), lambda: (0, 0),
                             memory_space=pltpu.MemorySpace.VMEM),
                pl.BlockSpec((1, PADDED_N), lambda: (0, 0),
                             memory_space=pltpu.MemorySpace.VMEM),
            ],
            out_specs=pl.BlockSpec((n, PADDED_N), lambda: (0, 0),
                                   memory_space=pltpu.MemorySpace.VMEM),
            cost_estimate=cost,
        )(z_all, w_eff_p, b_eff_p)

        # Drop lane padding (fuses with the epilogue inside this jit), then
        # reproduce torch's .view + block concatenation:
        #   per-embedding 144-vector -> (OUT_SIZE, IN_SIZE, f, f)
        #   cat along dim=1 within a row of K, cat along dim=0 across H rows.
        out = out[:, :FUSED_N]
        res = out.reshape(H, K, OUT_SIZE, IN_SIZE, F_SIZE, F_SIZE)
        res = res.transpose(0, 2, 1, 3, 4, 5)
        return res.reshape(H * OUT_SIZE, K * IN_SIZE, F_SIZE, F_SIZE)

    return forward


# ------------------------------ reference -----------------------------------
def embedding_forward_ref(z_all, w1, b1, w2, b2):
    rows = []
    for i in range(H):
        blocks = []
        for j in range(K):
            z = z_all[i * K + j]
            h_in = (jnp.dot(z, w1, precision=_HI) + b1).reshape(IN_SIZE, Z_DIM)
            h_fin = jnp.dot(h_in, w2, precision=_HI) + b2
            kernel = h_fin.reshape(OUT_SIZE, IN_SIZE, F_SIZE, F_SIZE)
            blocks.append(kernel)
        rows.append(jnp.concatenate(blocks, axis=1))
    return jnp.concatenate(rows, axis=0)


# --------------------------------- main --------------------------------------
if __name__ == "__main__":
    key = jax.random.PRNGKey(0)
    kz, k1, kb1, k2, kb2 = jax.random.split(key, 5)

    # Deterministic parameter init mimicking torch.fmod(torch.randn(...), 2).
    z_all = jnp.fmod(jax.random.normal(kz, (H * K, Z_DIM), jnp.float32), 2.0)
    w1 = jnp.fmod(jax.random.normal(k1, (Z_DIM, IN_SIZE * Z_DIM), jnp.float32), 2.0)
    b1 = jnp.fmod(jax.random.normal(kb1, (IN_SIZE * Z_DIM,), jnp.float32), 2.0)
    w2 = jnp.fmod(jax.random.normal(k2, (Z_DIM, OUT_FF), jnp.float32), 2.0)
    b2 = jnp.fmod(jax.random.normal(kb2, (OUT_FF,), jnp.float32), 2.0)

    # Fused weights built once here (hot path = the returned jitted forward).
    embedding_forward = make_embedding_forward(w1, b1, w2, b2)

    out = embedding_forward(z_all)
    out = jax.block_until_ready(out)
    # Second call exercises the cached/compiled hot path (no weight refusion).
    out = jax.block_until_ready(embedding_forward(z_all))

    ref = embedding_forward_ref(z_all, w1, b1, w2, b2)
    # Fused-weight formulation changes fp32 summation order vs. the two-stage
    # reference, so allow a slightly looser absolute tolerance.
    np.testing.assert_allclose(np.asarray(out), np.asarray(ref),
                               rtol=1e-5, atol=1e-4)
    assert out.shape == (H * OUT_SIZE, K * IN_SIZE, F_SIZE, F_SIZE)

    print("KERNEL_OK")
</pallas_src>

<mosaic_0001>
module attributes {stable_mosaic.version = 11 : i64} {
  func.func @embedding_hyper_kernel(%arg0: memref<6x32xf32, #tpu.memory_space<vmem>>, %arg1: memref<32x256xf32, #tpu.memory_space<vmem>>, %arg2: memref<1x256xf32, #tpu.memory_space<vmem>>, %arg3: memref<6x256xf32, #tpu.memory_space<vmem>>) attributes {dimension_semantics = [], scalar_prefetch = 0 : i64, scratch_operands = 0 : i64, tpu.core_type = #tpu.core_type<tc>} {
    %c0 = arith.constant 0 : index
    %c0_0 = arith.constant 0 : index
    %0 = vector.load %arg0[%c0, %c0_0] : memref<6x32xf32, #tpu.memory_space<vmem>>, vector<6x32xf32>
    %c0_1 = arith.constant 0 : index
    %c0_2 = arith.constant 0 : index
    %1 = vector.load %arg1[%c0_1, %c0_2] : memref<32x256xf32, #tpu.memory_space<vmem>>, vector<32x256xf32>
    %cst = arith.constant dense<0.000000e+00> : vector<6x256xf32>
    %2 = tpu.matmul %0, %1, %cst {dimension_numbers = #tpu.dot_dimension_numbers<[1], [0], [0], [1], [0, 0, 1, 1], [], []>} : vector<6x32xf32>, vector<32x256xf32>, vector<6x256xf32> -> vector<6x256xf32>
    %c0_3 = arith.constant 0 : index
    %c0_4 = arith.constant 0 : index
    %3 = vector.load %arg2[%c0_3, %c0_4] : memref<1x256xf32, #tpu.memory_space<vmem>>, vector<1x256xf32>
    %4 = vector.broadcast %3 : vector<1x256xf32> to vector<6x256xf32>
    %5 = arith.addf %2, %4 : vector<6x256xf32>
    %c0_5 = arith.constant 0 : index
    %c0_6 = arith.constant 0 : index
    %6 = vector.load %arg3[%c0_5, %c0_6] : memref<6x256xf32, #tpu.memory_space<vmem>>, vector<6x256xf32>
    tpu.vector_store %arg3[%c0_5, %c0_6], %5 {strides = array<i32>} : memref<6x256xf32, #tpu.memory_space<vmem>>, vector<6x256xf32>,
    return
  }
}

</mosaic_0001>

<bundles_post_ra>
// kernel: forward.1
= control target key start
LH: loop header
LB: loop body
LE: loop exit
PB: predicated region body
PF: predicated region fallthrough
CT: control target
= control target key end

     0   :  { %8 = vsyncpa [#allocation3], 0  ;;  %s247_s0 = inlined_call_operand.hbm [shape: f32[6,32], index: 0, kind: input, shape index: {}]   ;;  %s248_s1 = inlined_call_operand.hbm [shape: f32[32,256], index: 1, kind: input, shape index: {}]   ;;  %s249_s2 = inlined_call_operand.hbm [shape: f32[1,256], index: 2, kind: input, shape index: {}]   ;;  %s250_s3 = inlined_call_operand.vmem [shape: f32[6,256], index: 3, kind: output, shape index: {}]  }
   0x1   :  { %9 = vsyncpa [#allocation5], 0  ;;  %s25_s14 = sshll.u32 %s248_s1, 4  ;;  %s207_s15 = smov [#allocation4]   ;;  %s26_s14 = int_to_ptr.hbm [resolvable:$true] %s25_s14 }
   0x2   :  { %s27_s16 = sshll.u32 %s207_s15, 4  ;;  %s15_s19 = sshll.u32 %s247_s0, 4  ;;  %s28_s16 = int_to_ptr.vmem [resolvable:$true] %s27_s16  ;;  %s16_s19 = int_to_ptr.hbm [resolvable:$true] %s15_s19 }
   0x3   :  { %s208_s20 = smov 256   ;;  %s209_s21 = smov 16  }
   0x4   :  { %33 = dma.hbm_to_vmem [thread:$0]  %s26_s14, 1024, %s28_s16, [#allocation5], %s208_s20, %s208_s20, %s209_s21  }
   0x5   :  { %s210_s22 = smov [#allocation2]   ;;  %s39_s26 = sshll.u32 %s249_s2, 4  ;;  %s40_s26 = int_to_ptr.hbm [resolvable:$true] %s39_s26 }
   0x6   :  { %s17_s23 = sshll.u32 %s210_s22, 4  ;;  %s211_s1 = smov [#allocation6]   ;;  %s18_s23 = int_to_ptr.vmem [resolvable:$true] %s17_s23 }
   0x7   :  { %20 = dma.hbm_to_vmem [thread:$0]  %s16_s19, 128, %s18_s23, [#allocation3]  }
   0x8   :  { %s41_s27 = sshll.u32 %s211_s1, 4  ;;  %s42_s27 = int_to_ptr.vmem [resolvable:$true] %s41_s27 }
   0x9   :  { %44 = dma.hbm_to_vmem [thread:$0]  %s40_s26, 32, %s42_s27, [#allocation5]  }
   0xa   :  { %203 = dma.done.wait [#allocation3], 128  }
   0xb   :  { %204 = vsyncadd [#allocation3], 4294967168 }
   0xc   :  { %205 = dma.done.wait [#allocation5], 1056  }
   0xd   :  { %206 = vsyncadd [#allocation5], 4294966240  ;;  %v64_v0 = vld [vmem:[#allocation4 + $0x30] sm:$0xff]  ;;  %v65_v1 = vld [vmem:[#allocation4 + $0x38] sm:$0xff]  ;;  %vm72_vm0 = vcmask 261120  }
   0xe   :  { %v62_v2 = vld [vmem:[#allocation4 + $0x20] sm:$0xff]  ;;  %88 = vmatpush.msra.mxu0 %v64_v0  ;;  %108 = vmatpush.msra.mxu1 %v65_v1  ;;  %v63_v3 = vld [vmem:[#allocation4 + $0x28] sm:$0xff]  ;;  %v60_v4 = vld [vmem:[#allocation4 + $0x10] sm:$0xff] }
   0xf   :  { %v61_v5 = vld [vmem:[#allocation4 + $0x18] sm:$0xff]  ;;  %v58_v6 = vld [vmem:[#allocation4] sm:$0xff]  ;;  %v59_v7 = vld [vmem:[#allocation4 + $0x8] sm:$0xff] }
  0x10   :  { %89 = vmatpush.msra.mxu0 %v62_v2  ;;  %109 = vmatpush.msra.mxu1 %v63_v3  ;;  %v57_v8 = vld [vmem:[#allocation2] sm:$0x3f]  ;;  %v66_v9 = vld [vmem:[#allocation6] sm:$0x3] }
  0x11   :  { %v68_v10 = vperm.slane %v66_v9, 0  ;;  %v69_v11 = vperm.slane %v66_v9, 1 }
  0x12   :  { %90 = vmatpush.msra.mxu0 %v60_v4  ;;  %110 = vmatpush.msra.mxu1 %v61_v5 }
  0x14   :  { %91 = vmatpush.msra.mxu0 %v58_v6  ;;  %111 = vmatpush.msra.mxu1 %v59_v7 }
  0x15   :  { %124 = vmatmul.msk.f32.vlgmr.msra.gmra.mxu0 %vm72_vm0, %v57_v8  ;;  %125 = vmatmul.msk.f32.vlgmr.msra.gmra.mxu1 %vm72_vm0, %v57_v8 }
  0x92   :  { %v93_v12 = vpop.f32.mrf.mxu0  ;;  %v113_v13 = vpop.f32.mrf.mxu1 }
  0x93   :  { %v94_v14 = vadd.f32 %v93_v12, %v68_v10  ;;  %v114_v15 = vadd.f32 %v113_v13, %v69_v11 }
  0x95   :  { %116 = vst [vmem:[%s250_s3] sm:$0x3f] %v94_v14 }
  0x96   :  { %117 = vst [vmem:[%s250_s3 + $0x8] sm:$0x3f] %v114_v15 }
  0x97   :  { %122 = vsyncpa [#allocation3], 1 }
  0x98   :  { %123 = vsyncpa [#allocation5], 1 }

</bundles_post_ra>
